<compile_context>
chip_gen: v6e
topology: v6e:2x2x1
jax: 0.10.0
libtpu: 0.0.40
codegen_flags: <defaults>
</compile_context>

<pallas_src>
import functools

import jax
import jax.numpy as jnp
from jax import lax
from jax.experimental import pallas as pl
from jax.experimental.pallas import tpu as pltpu


def _sigmoid(x):
    # explicit exp-based sigmoid (EUP exp + VPU math); matches torch.sigmoid
    return 1.0 / (1.0 + jnp.exp(-x))


def _fused_kernel(T, B_tp,
                  text_ids_ref, vis_ids_ref, char_proj_ref, vis_emb_ref,
                  w_hh_ref, out_ref):
    """Whole forward pass in one kernel.

    text_ids_ref  : [T*B_tp, 1] int32  time-major char ids, batch padded to 8
    vis_ids_ref   : [B_vp, 1]   int32  object indices, padded to 8
    char_proj_ref : [V, 4H]     f32    precomputed char_emb @ w_ih + b   (review item 1)
    vis_emb_ref   : [N, H]      f32    visual feature table (index -> feature)
    w_hh_ref      : [H, 4H]     f32    LSTM weight_hh_l0 (pre-transposed)
    out_ref       : [B_vp, B_tp] f32   padded similarity matrix
    """
    H = w_hh_ref.shape[0]
    V = char_proj_ref.shape[0]
    N = vis_emb_ref.shape[0]
    TB = T * B_tp

    # ---- text path: one-hot "gather" of the already-projected vocab table ----
    ids = text_ids_ref[...]                                               # [TB, 1]
    onehot_t = (ids == lax.broadcasted_iota(jnp.int32, (TB, V), 1)
                ).astype(jnp.float32)                                     # [TB, V]
    xproj = jnp.dot(onehot_t, char_proj_ref[...],
                    preferred_element_type=jnp.float32)                   # [TB, 4H]

    # ---- LSTM recurrence, fully unrolled (T static & tiny) ----
    # Gate order follows PyTorch: [i, f, g, o]; h/c zero-initialized.
    # B_tp == 8 so every per-step slice below is a sublane-tile-aligned
    # static slice and h/c/gates are each exactly one f32 vreg.
    w_hh = w_hh_ref[...]
    h = jnp.zeros((B_tp, H), jnp.float32)
    c = jnp.zeros((B_tp, H), jnp.float32)
    for t in range(T):
        gates = xproj[t * B_tp:(t + 1) * B_tp, :] + jnp.dot(
            h, w_hh, preferred_element_type=jnp.float32)                  # [B_tp, 4H]
        # two full-vreg EUP passes instead of four per-gate passes (review item 3a)
        sg = _sigmoid(gates)
        tg = jnp.tanh(gates)
        i_g = sg[:, 0 * H:1 * H]
        f_g = sg[:, 1 * H:2 * H]
        g_g = tg[:, 2 * H:3 * H]
        o_g = sg[:, 3 * H:4 * H]
        c = f_g * c + i_g * g_g
        h = o_g * jnp.tanh(c)

    # ---- visual path: one-hot gather of object features ----
    vis_ids = vis_ids_ref[...]                                            # [B_vp, 1]
    B_vp = vis_ids.shape[0]
    onehot_v = (vis_ids == lax.broadcasted_iota(jnp.int32, (B_vp, N), 1)
                ).astype(jnp.float32)                                     # [B_vp, N]
    v = jnp.dot(onehot_v, vis_emb_ref[...],
                preferred_element_type=jnp.float32)                       # [B_vp, H]

    # ---- L2 normalize (eps-guarded rsqrt, EUP) + similarity ----
    eps = jnp.float32(1e-30)
    v_n = v * lax.rsqrt(jnp.maximum(jnp.sum(v * v, axis=1, keepdims=True), eps))
    t_n = h * lax.rsqrt(jnp.maximum(jnp.sum(h * h, axis=1, keepdims=True), eps))
    out_ref[...] = lax.dot_general(
        v_n, t_n, (((1,), (1,)), ((), ())),
        preferred_element_type=jnp.float32)                               # [B_vp, B_tp]


def prepare_params(raw):
    """One-time parameter prep (off the forward path): fold the LSTM input
    projection and both biases onto the char embedding table (review item 1)."""
    char_proj = jnp.dot(raw["char_emb"], raw["w_ih"],
                        precision=lax.Precision.HIGHEST) + raw["b"]       # [V, 4H]
    return {"char_proj": char_proj,
            "vis_emb": raw["vis_emb"],
            "w_hh": raw["w_hh"]}


def similarity_model_forward(visual_input, text_input, prepared):
    """visual_input: [B_v] int, text_input: [B_t, T] int -> [B_v, B_t] f32."""
    B_t, T = text_input.shape
    B_v = visual_input.shape[0]
    B_tp = max(8, ((B_t + 7) // 8) * 8)     # pad text batch to a sublane tile
    B_vp = max(8, ((B_v + 7) // 8) * 8)     # pad visual batch to a sublane tile

    # Tiny index preprocessing only (a few dozen int32s): pad batch with a valid
    # id (0), time-major flatten so each timestep's rows are contiguous and
    # sublane-aligned for the in-kernel slice.
    text_pad = jnp.zeros((B_tp, T), jnp.int32).at[:B_t, :].set(
        text_input.astype(jnp.int32))
    text_tm = jnp.transpose(text_pad, (1, 0)).reshape(T * B_tp, 1)
    vis_pad = jnp.zeros((B_vp,), jnp.int32).at[:B_v].set(
        visual_input.astype(jnp.int32)).reshape(B_vp, 1)

    vmem = pl.BlockSpec(memory_space=pltpu.MemorySpace.VMEM)
    kernel = functools.partial(_fused_kernel, T, B_tp)
    out_pad = pl.pallas_call(
        kernel,
        out_shape=jax.ShapeDtypeStruct((B_vp, B_tp), jnp.float32),
        in_specs=[vmem] * 5,
        out_specs=vmem,
    )(text_tm, vis_pad,
      prepared["char_proj"], prepared["vis_emb"], prepared["w_hh"])
    return out_pad[:B_v, :B_t]


def _reference_forward(visual_input, text_input, params):
    """Plain-JAX reference (f32, HIGHEST precision) for a correctness check."""
    hp = lax.Precision.HIGHEST
    H = params["w_hh"].shape[0]
    B_t, T = text_input.shape

    v = jnp.take(params["vis_emb"], visual_input, axis=0)
    x = jnp.take(params["char_emb"], text_input, axis=0)                  # [B_t, T, E]
    h = jnp.zeros((B_t, H), jnp.float32)
    c = jnp.zeros((B_t, H), jnp.float32)
    for t in range(T):
        gates = (jnp.dot(x[:, t, :], params["w_ih"], precision=hp)
                 + jnp.dot(h, params["w_hh"], precision=hp)
                 + params["b"])
        i_g = _sigmoid(gates[:, 0 * H:1 * H])
        f_g = _sigmoid(gates[:, 1 * H:2 * H])
        g_g = jnp.tanh(gates[:, 2 * H:3 * H])
        o_g = _sigmoid(gates[:, 3 * H:4 * H])
        c = f_g * c + i_g * g_g
        h = o_g * jnp.tanh(c)
    v_n = v / jnp.linalg.norm(v, axis=1, keepdims=True)
    t_n = h / jnp.linalg.norm(h, axis=1, keepdims=True)
    return jnp.dot(v_n, t_n.T, precision=hp)


if __name__ == "__main__":
    key = jax.random.PRNGKey(0)
    vocab_size = 20      # char vocabulary
    embed_dim = 50       # nn.Embedding(vocab_size, 50)
    hidden_size = 32     # LSTM hidden size
    nobjects = 6         # visual vocabulary (embedding-style extractor)
    B_v, B_t, T = 2, 3, 8

    keys = jax.random.split(key, 8)
    params = {
        "char_emb": 0.1 * jax.random.normal(keys[0], (vocab_size, embed_dim), jnp.float32),
        "vis_emb":  0.1 * jax.random.normal(keys[1], (nobjects, hidden_size), jnp.float32),
        # PyTorch LSTM weights are [4H, in]; stored here pre-transposed as [in, 4H].
        "w_ih":     0.1 * jax.random.normal(keys[2], (embed_dim, 4 * hidden_size), jnp.float32),
        "w_hh":     0.1 * jax.random.normal(keys[3], (hidden_size, 4 * hidden_size), jnp.float32),
        # combined bias b_ih + b_hh, kept 2D for TPU layout
        "b":        0.1 * jax.random.normal(keys[4], (1, 4 * hidden_size), jnp.float32),
    }

    visual_input = jax.random.randint(keys[5], (B_v,), 0, nobjects)       # object indices
    text_input = jax.random.randint(keys[6], (B_t, T), 0, vocab_size)     # char-id sequences

    prepared = prepare_params(params)                                     # one-time prep
    fwd = jax.jit(similarity_model_forward)
    sims = jax.block_until_ready(fwd(visual_input, text_input, prepared))
    assert sims.shape == (B_v, B_t)

    ref = jax.block_until_ready(_reference_forward(visual_input, text_input, params))
    max_err = float(jnp.max(jnp.abs(sims - ref)))
    assert jnp.allclose(sims, ref, atol=1e-2, rtol=1e-2), (
        f"mismatch vs reference, max abs err = {max_err}")
    print("KERNEL_OK")
</pallas_src>

<mosaic_0001>
module attributes {stable_mosaic.version = 11 : i64} {
  func.func @_fused_kernel(%arg0: memref<64x1xi32, #tpu.memory_space<vmem>>, %arg1: memref<8x1xi32, #tpu.memory_space<vmem>>, %arg2: memref<20x128xf32, #tpu.memory_space<vmem>>, %arg3: memref<6x32xf32, #tpu.memory_space<vmem>>, %arg4: memref<32x128xf32, #tpu.memory_space<vmem>>, %arg5: memref<8x8xf32, #tpu.memory_space<vmem>>) attributes {dimension_semantics = [], scalar_prefetch = 0 : i64, scratch_operands = 0 : i64, tpu.core_type = #tpu.core_type<tc>} {
    %c0 = arith.constant 0 : index
    %c0_0 = arith.constant 0 : index
    %0 = vector.load %arg0[%c0, %c0_0] : memref<64x1xi32, #tpu.memory_space<vmem>>, vector<64x1xi32>
    %1 = tpu.iota {dimensions = array<i32: 1>} : vector<64x20xi32>
    %2 = vector.broadcast %0 : vector<64x1xi32> to vector<64x20xi32>
    %3 = arith.cmpi eq, %2, %1 : vector<64x20xi32>
    %4 = arith.extui %3 : vector<64x20xi1> to vector<64x20xi32>
    %5 = arith.sitofp %4 : vector<64x20xi32> to vector<64x20xf32>
    %c0_1 = arith.constant 0 : index
    %c0_2 = arith.constant 0 : index
    %6 = vector.load %arg2[%c0_1, %c0_2] : memref<20x128xf32, #tpu.memory_space<vmem>>, vector<20x128xf32>
    %cst = arith.constant dense<0.000000e+00> : vector<64x128xf32>
    %7 = tpu.matmul %5, %6, %cst {dimension_numbers = #tpu.dot_dimension_numbers<[1], [0], [0], [1], [0, 0, 1, 1], [], []>} : vector<64x20xf32>, vector<20x128xf32>, vector<64x128xf32> -> vector<64x128xf32>
    %c0_3 = arith.constant 0 : index
    %c0_4 = arith.constant 0 : index
    %8 = vector.load %arg4[%c0_3, %c0_4] : memref<32x128xf32, #tpu.memory_space<vmem>>, vector<32x128xf32>
    %cst_5 = arith.constant 0.000000e+00 : f32
    %9 = vector.broadcast %cst_5 : f32 to vector<8x32xf32>
    %cst_6 = arith.constant 0.000000e+00 : f32
    %10 = vector.broadcast %cst_6 : f32 to vector<8x32xf32>
    %11 = vector.extract_strided_slice %7 {offsets = [0, 0], sizes = [8, 128], strides = [1, 1]} : vector<64x128xf32> to vector<8x128xf32>
    %cst_7 = arith.constant dense<0.000000e+00> : vector<8x128xf32>
    %12 = tpu.matmul %9, %8, %cst_7 {dimension_numbers = #tpu.dot_dimension_numbers<[1], [0], [0], [1], [0, 0, 1, 1], [], []>} : vector<8x32xf32>, vector<32x128xf32>, vector<8x128xf32> -> vector<8x128xf32>
    %13 = arith.addf %11, %12 : vector<8x128xf32>
    %cst_8 = arith.constant 0.000000e+00 : f32
    %14 = vector.broadcast %cst_8 : f32 to vector<8x128xf32>
    %15 = arith.subf %14, %13 : vector<8x128xf32>
    %16 = math.exp %15 : vector<8x128xf32>
    %cst_9 = arith.constant 1.000000e+00 : f32
    %17 = vector.broadcast %cst_9 : f32 to vector<8x128xf32>
    %18 = arith.addf %17, %16 : vector<8x128xf32>
    %cst_10 = arith.constant 1.000000e+00 : f32
    %19 = vector.broadcast %cst_10 : f32 to vector<8x128xf32>
    %20 = arith.divf %19, %18 : vector<8x128xf32>
    %21 = math.tanh %13 : vector<8x128xf32>
    %22 = vector.extract_strided_slice %20 {offsets = [0, 0], sizes = [8, 32], strides = [1, 1]} : vector<8x128xf32> to vector<8x32xf32>
    %23 = vector.extract_strided_slice %20 {offsets = [0, 32], sizes = [8, 32], strides = [1, 1]} : vector<8x128xf32> to vector<8x32xf32>
    %24 = vector.extract_strided_slice %21 {offsets = [0, 64], sizes = [8, 32], strides = [1, 1]} : vector<8x128xf32> to vector<8x32xf32>
    %25 = vector.extract_strided_slice %20 {offsets = [0, 96], sizes = [8, 32], strides = [1, 1]} : vector<8x128xf32> to vector<8x32xf32>
    %26 = arith.mulf %23, %10 : vector<8x32xf32>
    %27 = arith.mulf %22, %24 : vector<8x32xf32>
    %28 = arith.addf %26, %27 : vector<8x32xf32>
    %29 = math.tanh %28 : vector<8x32xf32>
    %30 = arith.mulf %25, %29 : vector<8x32xf32>
    %31 = vector.extract_strided_slice %7 {offsets = [8, 0], sizes = [8, 128], strides = [1, 1]} : vector<64x128xf32> to vector<8x128xf32>
    %cst_11 = arith.constant dense<0.000000e+00> : vector<8x128xf32>
    %32 = tpu.matmul %30, %8, %cst_11 {dimension_numbers = #tpu.dot_dimension_numbers<[1], [0], [0], [1], [0, 0, 1, 1], [], []>} : vector<8x32xf32>, vector<32x128xf32>, vector<8x128xf32> -> vector<8x128xf32>
    %33 = arith.addf %31, %32 : vector<8x128xf32>
    %cst_12 = arith.constant 0.000000e+00 : f32
    %34 = vector.broadcast %cst_12 : f32 to vector<8x128xf32>
    %35 = arith.subf %34, %33 : vector<8x128xf32>
    %36 = math.exp %35 : vector<8x128xf32>
    %cst_13 = arith.constant 1.000000e+00 : f32
    %37 = vector.broadcast %cst_13 : f32 to vector<8x128xf32>
    %38 = arith.addf %37, %36 : vector<8x128xf32>
    %cst_14 = arith.constant 1.000000e+00 : f32
    %39 = vector.broadcast %cst_14 : f32 to vector<8x128xf32>
    %40 = arith.divf %39, %38 : vector<8x128xf32>
    %41 = math.tanh %33 : vector<8x128xf32>
    %42 = vector.extract_strided_slice %40 {offsets = [0, 0], sizes = [8, 32], strides = [1, 1]} : vector<8x128xf32> to vector<8x32xf32>
    %43 = vector.extract_strided_slice %40 {offsets = [0, 32], sizes = [8, 32], strides = [1, 1]} : vector<8x128xf32> to vector<8x32xf32>
    %44 = vector.extract_strided_slice %41 {offsets = [0, 64], sizes = [8, 32], strides = [1, 1]} : vector<8x128xf32> to vector<8x32xf32>
    %45 = vector.extract_strided_slice %40 {offsets = [0, 96], sizes = [8, 32], strides = [1, 1]} : vector<8x128xf32> to vector<8x32xf32>
    %46 = arith.mulf %43, %28 : vector<8x32xf32>
    %47 = arith.mulf %42, %44 : vector<8x32xf32>
    %48 = arith.addf %46, %47 : vector<8x32xf32>
    %49 = math.tanh %48 : vector<8x32xf32>
    %50 = arith.mulf %45, %49 : vector<8x32xf32>
    %51 = vector.extract_strided_slice %7 {offsets = [16, 0], sizes = [8, 128], strides = [1, 1]} : vector<64x128xf32> to vector<8x128xf32>
    %cst_15 = arith.constant dense<0.000000e+00> : vector<8x128xf32>
    %52 = tpu.matmul %50, %8, %cst_15 {dimension_numbers = #tpu.dot_dimension_numbers<[1], [0], [0], [1], [0, 0, 1, 1], [], []>} : vector<8x32xf32>, vector<32x128xf32>, vector<8x128xf32> -> vector<8x128xf32>
    %53 = arith.addf %51, %52 : vector<8x128xf32>
    %cst_16 = arith.constant 0.000000e+00 : f32
    %54 = vector.broadcast %cst_16 : f32 to vector<8x128xf32>
    %55 = arith.subf %54, %53 : vector<8x128xf32>
    %56 = math.exp %55 : vector<8x128xf32>
    %cst_17 = arith.constant 1.000000e+00 : f32
    %57 = vector.broadcast %cst_17 : f32 to vector<8x128xf32>
    %58 = arith.addf %57, %56 : vector<8x128xf32>
    %cst_18 = arith.constant 1.000000e+00 : f32
    %59 = vector.broadcast %cst_18 : f32 to vector<8x128xf32>
    %60 = arith.divf %59, %58 : vector<8x128xf32>
    %61 = math.tanh %53 : vector<8x128xf32>
    %62 = vector.extract_strided_slice %60 {offsets = [0, 0], sizes = [8, 32], strides = [1, 1]} : vector<8x128xf32> to vector<8x32xf32>
    %63 = vector.extract_strided_slice %60 {offsets = [0, 32], sizes = [8, 32], strides = [1, 1]} : vector<8x128xf32> to vector<8x32xf32>
    %64 = vector.extract_strided_slice %61 {offsets = [0, 64], sizes = [8, 32], strides = [1, 1]} : vector<8x128xf32> to vector<8x32xf32>
    %65 = vector.extract_strided_slice %60 {offsets = [0, 96], sizes = [8, 32], strides = [1, 1]} : vector<8x128xf32> to vector<8x32xf32>
    %66 = arith.mulf %63, %48 : vector<8x32xf32>
    %67 = arith.mulf %62, %64 : vector<8x32xf32>
    %68 = arith.addf %66, %67 : vector<8x32xf32>
    %69 = math.tanh %68 : vector<8x32xf32>
    %70 = arith.mulf %65, %69 : vector<8x32xf32>
    %71 = vector.extract_strided_slice %7 {offsets = [24, 0], sizes = [8, 128], strides = [1, 1]} : vector<64x128xf32> to vector<8x128xf32>
    %cst_19 = arith.constant dense<0.000000e+00> : vector<8x128xf32>
    %72 = tpu.matmul %70, %8, %cst_19 {dimension_numbers = #tpu.dot_dimension_numbers<[1], [0], [0], [1], [0, 0, 1, 1], [], []>} : vector<8x32xf32>, vector<32x128xf32>, vector<8x128xf32> -> vector<8x128xf32>
    %73 = arith.addf %71, %72 : vector<8x128xf32>
    %cst_20 = arith.constant 0.000000e+00 : f32
    %74 = vector.broadcast %cst_20 : f32 to vector<8x128xf32>
    %75 = arith.subf %74, %73 : vector<8x128xf32>
    %76 = math.exp %75 : vector<8x128xf32>
    %cst_21 = arith.constant 1.000000e+00 : f32
    %77 = vector.broadcast %cst_21 : f32 to vector<8x128xf32>
    %78 = arith.addf %77, %76 : vector<8x128xf32>
    %cst_22 = arith.constant 1.000000e+00 : f32
    %79 = vector.broadcast %cst_22 : f32 to vector<8x128xf32>
    %80 = arith.divf %79, %78 : vector<8x128xf32>
    %81 = math.tanh %73 : vector<8x128xf32>
    %82 = vector.extract_strided_slice %80 {offsets = [0, 0], sizes = [8, 32], strides = [1, 1]} : vector<8x128xf32> to vector<8x32xf32>
    %83 = vector.extract_strided_slice %80 {offsets = [0, 32], sizes = [8, 32], strides = [1, 1]} : vector<8x128xf32> to vector<8x32xf32>
    %84 = vector.extract_strided_slice %81 {offsets = [0, 64], sizes = [8, 32], strides = [1, 1]} : vector<8x128xf32> to vector<8x32xf32>
    %85 = vector.extract_strided_slice %80 {offsets = [0, 96], sizes = [8, 32], strides = [1, 1]} : vector<8x128xf32> to vector<8x32xf32>
    %86 = arith.mulf %83, %68 : vector<8x32xf32>
    %87 = arith.mulf %82, %84 : vector<8x32xf32>
    %88 = arith.addf %86, %87 : vector<8x32xf32>
    %89 = math.tanh %88 : vector<8x32xf32>
    %90 = arith.mulf %85, %89 : vector<8x32xf32>
    %91 = vector.extract_strided_slice %7 {offsets = [32, 0], sizes = [8, 128], strides = [1, 1]} : vector<64x128xf32> to vector<8x128xf32>
    %cst_23 = arith.constant dense<0.000000e+00> : vector<8x128xf32>
    %92 = tpu.matmul %90, %8, %cst_23 {dimension_numbers = #tpu.dot_dimension_numbers<[1], [0], [0], [1], [0, 0, 1, 1], [], []>} : vector<8x32xf32>, vector<32x128xf32>, vector<8x128xf32> -> vector<8x128xf32>
    %93 = arith.addf %91, %92 : vector<8x128xf32>
    %cst_24 = arith.constant 0.000000e+00 : f32
    %94 = vector.broadcast %cst_24 : f32 to vector<8x128xf32>
    %95 = arith.subf %94, %93 : vector<8x128xf32>
    %96 = math.exp %95 : vector<8x128xf32>
    %cst_25 = arith.constant 1.000000e+00 : f32
    %97 = vector.broadcast %cst_25 : f32 to vector<8x128xf32>
    %98 = arith.addf %97, %96 : vector<8x128xf32>
    %cst_26 = arith.constant 1.000000e+00 : f32
    %99 = vector.broadcast %cst_26 : f32 to vector<8x128xf32>
    %100 = arith.divf %99, %98 : vector<8x128xf32>
    %101 = math.tanh %93 : vector<8x128xf32>
    %102 = vector.extract_strided_slice %100 {offsets = [0, 0], sizes = [8, 32], strides = [1, 1]} : vector<8x128xf32> to vector<8x32xf32>
    %103 = vector.extract_strided_slice %100 {offsets = [0, 32], sizes = [8, 32], strides = [1, 1]} : vector<8x128xf32> to vector<8x32xf32>
    %104 = vector.extract_strided_slice %101 {offsets = [0, 64], sizes = [8, 32], strides = [1, 1]} : vector<8x128xf32> to vector<8x32xf32>
    %105 = vector.extract_strided_slice %100 {offsets = [0, 96], sizes = [8, 32], strides = [1, 1]} : vector<8x128xf32> to vector<8x32xf32>
    %106 = arith.mulf %103, %88 : vector<8x32xf32>
    %107 = arith.mulf %102, %104 : vector<8x32xf32>
    %108 = arith.addf %106, %107 : vector<8x32xf32>
    %109 = math.tanh %108 : vector<8x32xf32>
    %110 = arith.mulf %105, %109 : vector<8x32xf32>
    %111 = vector.extract_strided_slice %7 {offsets = [40, 0], sizes = [8, 128], strides = [1, 1]} : vector<64x128xf32> to vector<8x128xf32>
    %cst_27 = arith.constant dense<0.000000e+00> : vector<8x128xf32>
    %112 = tpu.matmul %110, %8, %cst_27 {dimension_numbers = #tpu.dot_dimension_numbers<[1], [0], [0], [1], [0, 0, 1, 1], [], []>} : vector<8x32xf32>, vector<32x128xf32>, vector<8x128xf32> -> vector<8x128xf32>
    %113 = arith.addf %111, %112 : vector<8x128xf32>
    %cst_28 = arith.constant 0.000000e+00 : f32
    %114 = vector.broadcast %cst_28 : f32 to vector<8x128xf32>
    %115 = arith.subf %114, %113 : vector<8x128xf32>
    %116 = math.exp %115 : vector<8x128xf32>
    %cst_29 = arith.constant 1.000000e+00 : f32
    %117 = vector.broadcast %cst_29 : f32 to vector<8x128xf32>
    %118 = arith.addf %117, %116 : vector<8x128xf32>
    %cst_30 = arith.constant 1.000000e+00 : f32
    %119 = vector.broadcast %cst_30 : f32 to vector<8x128xf32>
    %120 = arith.divf %119, %118 : vector<8x128xf32>
    %121 = math.tanh %113 : vector<8x128xf32>
    %122 = vector.extract_strided_slice %120 {offsets = [0, 0], sizes = [8, 32], strides = [1, 1]} : vector<8x128xf32> to vector<8x32xf32>
    %123 = vector.extract_strided_slice %120 {offsets = [0, 32], sizes = [8, 32], strides = [1, 1]} : vector<8x128xf32> to vector<8x32xf32>
    %124 = vector.extract_strided_slice %121 {offsets = [0, 64], sizes = [8, 32], strides = [1, 1]} : vector<8x128xf32> to vector<8x32xf32>
    %125 = vector.extract_strided_slice %120 {offsets = [0, 96], sizes = [8, 32], strides = [1, 1]} : vector<8x128xf32> to vector<8x32xf32>
    %126 = arith.mulf %123, %108 : vector<8x32xf32>
    %127 = arith.mulf %122, %124 : vector<8x32xf32>
    %128 = arith.addf %126, %127 : vector<8x32xf32>
    %129 = math.tanh %128 : vector<8x32xf32>
    %130 = arith.mulf %125, %129 : vector<8x32xf32>
    %131 = vector.extract_strided_slice %7 {offsets = [48, 0], sizes = [8, 128], strides = [1, 1]} : vector<64x128xf32> to vector<8x128xf32>
    %cst_31 = arith.constant dense<0.000000e+00> : vector<8x128xf32>
    %132 = tpu.matmul %130, %8, %cst_31 {dimension_numbers = #tpu.dot_dimension_numbers<[1], [0], [0], [1], [0, 0, 1, 1], [], []>} : vector<8x32xf32>, vector<32x128xf32>, vector<8x128xf32> -> vector<8x128xf32>
    %133 = arith.addf %131, %132 : vector<8x128xf32>
    %cst_32 = arith.constant 0.000000e+00 : f32
    %134 = vector.broadcast %cst_32 : f32 to vector<8x128xf32>
    %135 = arith.subf %134, %133 : vector<8x128xf32>
    %136 = math.exp %135 : vector<8x128xf32>
    %cst_33 = arith.constant 1.000000e+00 : f32
    %137 = vector.broadcast %cst_33 : f32 to vector<8x128xf32>
    %138 = arith.addf %137, %136 : vector<8x128xf32>
    %cst_34 = arith.constant 1.000000e+00 : f32
    %139 = vector.broadcast %cst_34 : f32 to vector<8x128xf32>
    %140 = arith.divf %139, %138 : vector<8x128xf32>
    %141 = math.tanh %133 : vector<8x128xf32>
    %142 = vector.extract_strided_slice %140 {offsets = [0, 0], sizes = [8, 32], strides = [1, 1]} : vector<8x128xf32> to vector<8x32xf32>
    %143 = vector.extract_strided_slice %140 {offsets = [0, 32], sizes = [8, 32], strides = [1, 1]} : vector<8x128xf32> to vector<8x32xf32>
    %144 = vector.extract_strided_slice %141 {offsets = [0, 64], sizes = [8, 32], strides = [1, 1]} : vector<8x128xf32> to vector<8x32xf32>
    %145 = vector.extract_strided_slice %140 {offsets = [0, 96], sizes = [8, 32], strides = [1, 1]} : vector<8x128xf32> to vector<8x32xf32>
    %146 = arith.mulf %143, %128 : vector<8x32xf32>
    %147 = arith.mulf %142, %144 : vector<8x32xf32>
    %148 = arith.addf %146, %147 : vector<8x32xf32>
    %149 = math.tanh %148 : vector<8x32xf32>
    %150 = arith.mulf %145, %149 : vector<8x32xf32>
    %151 = vector.extract_strided_slice %7 {offsets = [56, 0], sizes = [8, 128], strides = [1, 1]} : vector<64x128xf32> to vector<8x128xf32>
    %cst_35 = arith.constant dense<0.000000e+00> : vector<8x128xf32>
    %152 = tpu.matmul %150, %8, %cst_35 {dimension_numbers = #tpu.dot_dimension_numbers<[1], [0], [0], [1], [0, 0, 1, 1], [], []>} : vector<8x32xf32>, vector<32x128xf32>, vector<8x128xf32> -> vector<8x128xf32>
    %153 = arith.addf %151, %152 : vector<8x128xf32>
    %cst_36 = arith.constant 0.000000e+00 : f32
    %154 = vector.broadcast %cst_36 : f32 to vector<8x128xf32>
    %155 = arith.subf %154, %153 : vector<8x128xf32>
    %156 = math.exp %155 : vector<8x128xf32>
    %cst_37 = arith.constant 1.000000e+00 : f32
    %157 = vector.broadcast %cst_37 : f32 to vector<8x128xf32>
    %158 = arith.addf %157, %156 : vector<8x128xf32>
    %cst_38 = arith.constant 1.000000e+00 : f32
    %159 = vector.broadcast %cst_38 : f32 to vector<8x128xf32>
    %160 = arith.divf %159, %158 : vector<8x128xf32>
    %161 = math.tanh %153 : vector<8x128xf32>
    %162 = vector.extract_strided_slice %160 {offsets = [0, 0], sizes = [8, 32], strides = [1, 1]} : vector<8x128xf32> to vector<8x32xf32>
    %163 = vector.extract_strided_slice %160 {offsets = [0, 32], sizes = [8, 32], strides = [1, 1]} : vector<8x128xf32> to vector<8x32xf32>
    %164 = vector.extract_strided_slice %161 {offsets = [0, 64], sizes = [8, 32], strides = [1, 1]} : vector<8x128xf32> to vector<8x32xf32>
    %165 = vector.extract_strided_slice %160 {offsets = [0, 96], sizes = [8, 32], strides = [1, 1]} : vector<8x128xf32> to vector<8x32xf32>
    %166 = arith.mulf %163, %148 : vector<8x32xf32>
    %167 = arith.mulf %162, %164 : vector<8x32xf32>
    %168 = arith.addf %166, %167 : vector<8x32xf32>
    %169 = math.tanh %168 : vector<8x32xf32>
    %170 = arith.mulf %165, %169 : vector<8x32xf32>
    %c0_39 = arith.constant 0 : index
    %c0_40 = arith.constant 0 : index
    %171 = vector.load %arg1[%c0_39, %c0_40] : memref<8x1xi32, #tpu.memory_space<vmem>>, vector<8x1xi32>
    %172 = tpu.iota {dimensions = array<i32: 1>} : vector<8x6xi32>
    %173 = vector.broadcast %171 : vector<8x1xi32> to vector<8x6xi32>
    %174 = arith.cmpi eq, %173, %172 : vector<8x6xi32>
    %175 = arith.extui %174 : vector<8x6xi1> to vector<8x6xi32>
    %176 = arith.sitofp %175 : vector<8x6xi32> to vector<8x6xf32>
    %c0_41 = arith.constant 0 : index
    %c0_42 = arith.constant 0 : index
    %177 = vector.load %arg3[%c0_41, %c0_42] : memref<6x32xf32, #tpu.memory_space<vmem>>, vector<6x32xf32>
    %cst_43 = arith.constant dense<0.000000e+00> : vector<8x32xf32>
    %178 = tpu.matmul %176, %177, %cst_43 {dimension_numbers = #tpu.dot_dimension_numbers<[1], [0], [0], [1], [0, 0, 1, 1], [], []>} : vector<8x6xf32>, vector<6x32xf32>, vector<8x32xf32> -> vector<8x32xf32>
    %179 = arith.mulf %178, %178 : vector<8x32xf32>
    %cst_44 = arith.constant dense<0.000000e+00> : vector<8xf32>
    %180 = vector.multi_reduction <add>, %179, %cst_44 [1] : vector<8x32xf32> to vector<8xf32>
    %181 = vector.shape_cast %180 : vector<8xf32> to vector<8x1xf32>
    %cst_45 = arith.constant 1.000000e-30 : f32
    %182 = vector.broadcast %cst_45 : f32 to vector<8x1xf32>
    %183 = arith.maximumf %181, %182 : vector<8x1xf32>
    %184 = math.rsqrt %183 : vector<8x1xf32>
    %185 = vector.broadcast %184 : vector<8x1xf32> to vector<8x32xf32>
    %186 = arith.mulf %178, %185 : vector<8x32xf32>
    %187 = arith.mulf %170, %170 : vector<8x32xf32>
    %cst_46 = arith.constant dense<0.000000e+00> : vector<8xf32>
    %188 = vector.multi_reduction <add>, %187, %cst_46 [1] : vector<8x32xf32> to vector<8xf32>
    %189 = vector.shape_cast %188 : vector<8xf32> to vector<8x1xf32>
    %cst_47 = arith.constant 1.000000e-30 : f32
    %190 = vector.broadcast %cst_47 : f32 to vector<8x1xf32>
    %191 = arith.maximumf %189, %190 : vector<8x1xf32>
    %192 = math.rsqrt %191 : vector<8x1xf32>
    %193 = vector.broadcast %192 : vector<8x1xf32> to vector<8x32xf32>
    %194 = arith.mulf %170, %193 : vector<8x32xf32>
    %cst_48 = arith.constant dense<0.000000e+00> : vector<8x8xf32>
    %195 = tpu.matmul %186, %194, %cst_48 {dimension_numbers = #tpu.dot_dimension_numbers<[1], [1], [0], [0], [0, 0, 1, 0], [], []>} : vector<8x32xf32>, vector<8x32xf32>, vector<8x8xf32> -> vector<8x8xf32>
    %c0_49 = arith.constant 0 : index
    %c0_50 = arith.constant 0 : index
    %196 = vector.load %arg5[%c0_49, %c0_50] : memref<8x8xf32, #tpu.memory_space<vmem>>, vector<8x8xf32>
    tpu.vector_store %arg5[%c0_49, %c0_50], %195 {strides = array<i32>} : memref<8x8xf32, #tpu.memory_space<vmem>>, vector<8x8xf32>,
    return
  }
}

</mosaic_0001>

<bundles_post_ra>
// kernel: similarity_model_forward.1
= control target key start
LH: loop header
LB: loop body
LE: loop exit
PB: predicated region body
PF: predicated region fallthrough
CT: control target
= control target key end

     0   :  { %vm106_vm0 = vcmask 1043456   ;;  %v1481_v0 = vmov 0   ;;  %v1482_v2 = vmov 0.0   ;;  %vm1483_vm1 = vmmov 0   ;;  %s1753_s0 = inlined_call_operand.vmem [shape: s32[64,1], index: 0, kind: input, shape index: {}]   ;;  %s1754_s4 = inlined_call_operand.vmem [shape: f32[32,128], index: 4, kind: input, shape index: {}]   ;;  %s1755_s2 = inlined_call_operand.vmem [shape: f32[20,128], index: 2, kind: input, shape index: {}]   ;;  %s1756_s1 = inlined_call_operand.vmem [shape: s32[8,1], index: 1, kind: input, shape index: {}]   ;;  %s1757_s3 = inlined_call_operand.vmem [shape: f32[6,32], index: 3, kind: input, shape index: {}]   ;;  %s1758_s5 = inlined_call_operand.vmem [shape: f32[8,8], index: 5, kind: output, shape index: {}]  }
   0x1   :  { %1411 = vset.pattern.permute.xlu0 %v1481_v0  ;;  %v20_v1 = vld [vmem:[%s1753_s0] sm:$0xff]  ;;  %1308 = vmatprep.subr.mxu1 %v1482_v2  ;;  %v1523_v3 = vld [vmem:[%s1754_s4 + $0x18] sm:$0xff]  ;;  %v80_v4 = vld [vmem:[%s1755_s2 + $0x10] sm:$0xf]  ;;  %v28_v11 = vlaneseq  ;;  %vm81_vm2 = vcmask 162816   ;;  %vm219_vm5 = vcmask 261120  }
   0x2   :  { %31 = vperm.xlu0 %1411, %v20_v1   ;;  %1309 = vmatpush3.msra.mxu1 %v1523_v3  ;;  %v1532_v5 = vld [vmem:[%s1754_s4 + $0x10] sm:$0xff]  ;;  %v79_v6 = vld [vmem:[%s1755_s2 + $0x8] sm:$0xff]  ;;  %v78_v9 = vld [vmem:[%s1755_s2] sm:$0xff]  ;;  %s1484_s2 = smov 64   ;;  %vm1030_vm12 = vcmask 1045504   ;;  %vm1026_vm13 = vcmask 48128  }
   0x3   :  { %v21_v7 = vld [vmem:[%s1753_s0 + $0x8] sm:$0xff]  ;;  %1290 = vmatprep.subr.msk.mxu0 %vm106_vm0, %v80_v4  ;;  %1310 = vmatprep.subr.mxu1 %v1482_v2  ;;  %v1554_v10 = vld [vmem:[%s1754_s4] sm:$0xff]  ;;  %v1574_v12 = vand.u32 127, %v28_v11  ;;  %v22_v48 = vld [vmem:[%s1753_s0 + $0x10] sm:$0xff]  ;;  %vm1200_vm15 = vcmask 64512  }
   0x4   :  { %1291 = vmatpush3.msk.msra.mxu0 %vm106_vm0, %v80_v4  ;;  %1311 = vmatpush3.msra.mxu1 %v1532_v5  ;;  %v1545_v8 = vld [vmem:[%s1754_s4 + $0x8] sm:$0xff]  ;;  %s1485_s4 = smov 32   ;;  %v24_v49 = vld [vmem:[%s1753_s0 + $0x20] sm:$0xff]  ;;  %v26_v50 = vld [vmem:[%s1753_s0 + $0x30] sm:$0xff] }
   0x5   :  { %1292 = vmatprep.subr.mxu0 %v79_v6  ;;  %1312 = vmatprep.subr.mxu1 %v1482_v2  ;;  %v23_v57 = vld [vmem:[%s1753_s0 + $0x18] sm:$0xff]  ;;  %v25_v58 = vld [vmem:[%s1753_s0 + $0x28] sm:$0xff] }
   0x6   :  { %34 = vperm.xlu0 %1411, %v21_v7   ;;  %1293 = vmatpush3.msra.mxu0 %v79_v6  ;;  %v27_v59 = vld [vmem:[%s1753_s0 + $0x38] sm:$0xff] }
   0x7   :  { %1313 = vmatpush3.msra.mxu1 %v1545_v8  ;;  %1294 = vmatprep.subr.mxu0 %v78_v9 }
   0x8   :  { %1314 = vmatprep.subr.mxu1 %v1482_v2  ;;  %1295 = vmatpush3.msra.mxu0 %v78_v9 }
   0x9   :  { %1315 = vmatpush3.msra.mxu1 %v1554_v10  ;;  %1316 = vmatprep.mubr.msk.f32.mxu1 %vm1483_vm1, %v1482_v2 }
   0xa   :  { %1317 = vmatmul.mubr.f32.vlgmr.msra.gmra.mxu1 %v1482_v2  ;;  %1319 = vmatprep.subr.mxu1 %v1482_v2 }
   0xb   :  { %1320 = vmatpush3.msra.mxu1 %v1523_v3  ;;  %1327 = vmatprep.mubr.msk.f32.mxu1 %vm1483_vm1, %v1482_v2 }
   0xc   :  { %1321 = vmatprep.subr.mxu1 %v1482_v2  ;;  %1412 = vset.pattern.permute.xlu1 %v1481_v0 }
   0xd   :  { %1322 = vmatpush3.msra.mxu1 %v1532_v5  ;;  %1330 = vmatprep.subr.mxu0 %v1482_v2 }
   0xe   :  { %1323 = vmatprep.subr.mxu1 %v1482_v2 }
   0xf   :  { %1324 = vmatpush3.msra.mxu1 %v1545_v8 }
  0x10   :  { %1325 = vmatprep.subr.mxu1 %v1482_v2 }
  0x11   :  { %1326 = vmatpush3.msra.mxu1 %v1554_v10 }
  0x12   :  { %1341 = vmatprep.subr.mxu1 %v1482_v2 }
  0x7d   :  { %v32_v13 = vpop.permute.xlu0 %31 }
  0x7e   :  { %vm54_vm3 = vcmp.eq.s32.totalorder %v32_v13, %v1574_v12 }
  0x7f   :  { %v1206_v14 = vsel %vm54_vm3, 1.0, %v1482_v2 }
  0x80   :  { %1296 = vmatprep.mubr.msk.f32.mxu0 %vm81_vm2, %v1206_v14 }
  0x81   :  { %v35_v15 = vpop.permute.xlu0 %34 }
  0x82   :  { %vm55_vm4 = vcmp.eq.s32.totalorder %v35_v15, %v1574_v12 }
  0x83   :  { %v1207_v16 = vsel %vm55_vm4, 1.0, %v1482_v2 }
  0x84   :  { %1297 = vmatmul.mubr.msk.f32.vlgmr.msra.gmra.mxu0 %vm81_vm2, %v1207_v16 }
  0x85   :  { %1331 = vmatpush3.msra.mxu0 %v1523_v3 }
  0x86   :  { %1332 = vmatprep.subr.mxu0 %v1482_v2 }
  0x87   :  { %1333 = vmatpush3.msra.mxu0 %v1532_v5 }
  0x88   :  { %1334 = vmatprep.subr.mxu0 %v1482_v2 }
  0x89   :  { %1335 = vmatpush3.msra.mxu0 %v1545_v8 }
  0x8a   :  { %1336 = vmatprep.subr.mxu0 %v1482_v2 }
  0x8b   :  { %1337 = vmatpush3.msra.mxu0 %v1554_v10 }
  0x8c   :  { %1352 = vmatprep.subr.mxu0 %v1482_v2 }
  0xca   :  { %v289_v17 = vpop.f32.mrf.mxu1 }
  0xcc   :  { %v1318_v18 = vpop.f32.mrf.mxu1 }
 0x144   :  { %v1298_v19 = vpop.f32.mrf.mxu0 }
 0x146   :  { %v176_v20 = vpop.f32.mrf.mxu0 }
 0x147   :  { %v293_v21 = vadd.f32 %v289_v17, %v176_v20 }
 0x149   :  { %1413 = vtanh.f32 %v293_v21  ;;  %v294_v23 = vsub.f32 0.0, %v293_v21 }
 0x14b   :  { %v295_v24 = vmul.f32 1.442695, %v294_v23 }
 0x14d   :  { %1415 = vpow2.f32 %v295_v24 }
 0x156   :  { %v1414_v22 = vpop.eup %1413 }
 0x157   :  { %303 = vrot.lane.b32.xlu1 %v1414_v22, %s1484_s2 }
 0x15a   :  { %v1416_v25 = vpop.eup %1415 }
 0x15b   :  { %v297_v26 = vadd.f32 1.0, %v1416_v25 }
 0x15d   :  { %1417 = vrcp.f32 %v297_v26 }
 0x16a   :  { %v1418_v27 = vpop.eup %1417 }
 0x16b   :  { %v301_v30 = vmul.f32 0.0, %v1418_v27 }
 0x1c9   :  { %v304_v28 = vpop.permute.xlu1 %303 }
 0x1ca   :  { %v306_v29 = vmul.f32 %v1418_v27, %v304_v28 }
 0x1cc   :  { %308 = vrot.lane.b32.xlu1 %v306_v29, %s1485_s4 }
 0x23e   :  { %v309_v31 = vpop.permute.xlu1 %308 }
 0x23f   :  { %v311_v32 = vadd.f32 %v309_v31, %v301_v30 }
 0x241   :  { %1419 = vtanh.f32 %v311_v32 }
 0x24e   :  { %v1420_v33 = vpop.eup %1419 }
 0x24f   :  { %314 = vrot.lane.b32.xlu0 %v1420_v33, %s1484_s2 }
 0x2c1   :  { %v315_v34 = vpop.permute.xlu0 %314 }
 0x2c2   :  { %v317_v35 = vmul.f32 %v1418_v27, %v315_v34 }
 0x2c4   :  { %319 = vrot.lane.b32.xlu1 %v317_v35, %s1485_s4 }
 0x336   :  { %v320_v36 = vpop.permute.xlu1 %319 }
 0x337   :  { %1328 = vmatmul.mubr.msk.f32.vlgmr.msra.gmra.mxu1 %vm219_vm5, %v320_v36 }
 0x338   :  { %1342 = vmatpush3.msra.mxu1 %v1523_v3  ;;  %1349 = vmatprep.mubr.msk.f32.mxu1 %vm1483_vm1, %v1482_v2 }
 0x339   :  { %1343 = vmatprep.subr.mxu1 %v1482_v2 }
 0x33a   :  { %1344 = vmatpush3.msra.mxu1 %v1532_v5 }
 0x33b   :  { %1345 = vmatprep.subr.mxu1 %v1482_v2 }
 0x33c   :  { %1346 = vmatpush3.msra.mxu1 %v1545_v8 }
 0x33d   :  { %1347 = vmatprep.subr.mxu1 %v1482_v2 }
 0x33e   :  { %1348 = vmatpush3.msra.mxu1 %v1554_v10 }
 0x33f   :  { %1363 = vmatprep.subr.mxu1 %v1482_v2 }
 0x3f7   :  { %v389_v37 = vpop.f32.mrf.mxu1 }
 0x3f8   :  { %v393_v38 = vadd.f32 %v1298_v19, %v389_v37 }
 0x3f9   :  { %v1329_v39 = vpop.f32.mrf.mxu1 }
 0x3fa   :  { %1421 = vtanh.f32 %v393_v38  ;;  %v394_v41 = vsub.f32 0.0, %v393_v38 }
 0x3fc   :  { %v395_v42 = vmul.f32 1.442695, %v394_v41 }
 0x3fe   :  { %1423 = vpow2.f32 %v395_v42 }
 0x407   :  { %v1422_v40 = vpop.eup %1421 }
 0x408   :  { %403 = vrot.lane.b32.xlu0 %v1422_v40, %s1484_s2 }
 0x40b   :  { %v1424_v43 = vpop.eup %1423 }
 0x40c   :  { %v397_v44 = vadd.f32 1.0, %v1424_v43 }
 0x40e   :  { %1425 = vrcp.f32 %v397_v44 }
 0x41b   :  { %v1426_v45 = vpop.eup %1425 }
 0x41c   :  { %v401_v51 = vmul.f32 %v1426_v45, %v311_v32 }
 0x47a   :  { %v404_v46 = vpop.permute.xlu0 %403 }
 0x47b   :  { %v406_v47 = vmul.f32 %v1426_v45, %v404_v46 }
 0x47d   :  { %408 = vrot.lane.b32.xlu1 %v406_v47, %s1485_s4 }
 0x481   :  { %37 = vperm.xlu1 %1412, %v22_v48  }
 0x485   :  { %43 = vperm.xlu1 %1412, %v24_v49  }
 0x489   :  { %49 = vperm.xlu1 %1412, %v26_v50  }
 0x4ef   :  { %v409_v52 = vpop.permute.xlu1 %408 }
 0x4f0   :  { %v1616_v53 = vadd.f32 %v409_v52, %v401_v51 }
 0x4f2   :  { %1427 = vtanh.f32 %v1616_v53 }
 0x4fc   :  { %v38_v54 = vpop.permute.xlu1 %37 }
 0x4fd   :  { %vm56_vm6 = vcmp.eq.s32.totalorder %v38_v54, %v1574_v12 }
 0x4fe   :  { %v1208_v55 = vsel %vm56_vm6, 1.0, %v1482_v2 }
 0x4ff   :  { %v1428_v56 = vpop.eup %1427  ;;  %1299 = vmatprep.mubr.msk.f32.mxu0 %vm81_vm2, %v1208_v55 }
 0x500   :  { %414 = vrot.lane.b32.xlu0 %v1428_v56, %s1484_s2  ;;  %v44_v62 = vpop.permute.xlu1 %43 }
 0x501   :  { %vm58_vm7 = vcmp.eq.s32.totalorder %v44_v62, %v1574_v12 }
 0x502   :  { %v1210_v1 = vsel %vm58_vm7, 1.0, %v1482_v2 }
 0x504   :  { %40 = vperm.xlu0 %1411, %v23_v57   ;;  %v50_v63 = vpop.permute.xlu1 %49 }
 0x505   :  { %vm60_vm9 = vcmp.eq.s32.totalorder %v50_v63, %v1574_v12 }
 0x506   :  { %v1212_v7 = vsel %vm60_vm9, 1.0, %v1482_v2 }
 0x508   :  { %46 = vperm.xlu0 %1411, %v25_v58  }
 0x50c   :  { %52 = vperm.xlu0 %1411, %v27_v59  }
 0x572   :  { %v415_v60 = vpop.permute.xlu0 %414 }
 0x573   :  { %v417_v61 = vmul.f32 %v1426_v45, %v415_v60 }
 0x575   :  { %419 = vrot.lane.b32.xlu1 %v417_v61, %s1485_s4 }
 0x57f   :  { %v41_v0 = vpop.permute.xlu0 %40 }
 0x580   :  { %vm57_vm8 = vcmp.eq.s32.totalorder %v41_v0, %v1574_v12 }
 0x581   :  { %v1209_v4 = vsel %vm57_vm8, 1.0, %v1482_v2 }
 0x582   :  { %1300 = vmatmul.mubr.msk.f32.gmra.mxu0 %vm81_vm2, %v1209_v4 }
 0x583   :  { %v47_v6 = vpop.permute.xlu0 %46  ;;  %1302 = vmatprep.mubr.msk.f32.mxu0 %vm81_vm2, %v1210_v1 }
 0x584   :  { %vm59_vm10 = vcmp.eq.s32.totalorder %v47_v6, %v1574_v12 }
 0x585   :  { %v1211_v9 = vsel %vm59_vm10, 1.0, %v1482_v2 }
 0x586   :  { %1303 = vmatmul.mubr.msk.f32.gmra.mxu0 %vm81_vm2, %v1211_v9 }
 0x587   :  { %v53_v11 = vpop.permute.xlu0 %52  ;;  %1305 = vmatprep.mubr.msk.f32.mxu0 %vm81_vm2, %v1212_v7 }
 0x588   :  { %vm61_vm11 = vcmp.eq.s32.totalorder %v53_v11, %v1574_v12 }
 0x589   :  { %v1213_v13 = vsel %vm61_vm11, 1.0, %v1482_v2 }
 0x58a   :  { %1306 = vmatmul.mubr.msk.f32.gmra.mxu0 %vm81_vm2, %v1213_v13 }
 0x58b   :  { %1338 = vmatprep.mubr.msk.f32.mxu0 %vm1483_vm1, %v1482_v2 }
 0x5e7   :  { %v420_v14 = vpop.permute.xlu1 %419 }
 0x5e8   :  { %1339 = vmatmul.mubr.msk.f32.vlgmr.msra.gmra.mxu0 %vm219_vm5, %v420_v14 }
 0x5e9   :  { %1353 = vmatpush3.msra.mxu0 %v1523_v3  ;;  %1360 = vmatprep.mubr.msk.f32.mxu0 %vm1483_vm1, %v1482_v2 }
 0x5ea   :  { %1354 = vmatprep.subr.mxu0 %v1482_v2 }
 0x5eb   :  { %1355 = vmatpush3.msra.mxu0 %v1532_v5 }
 0x5ec   :  { %1356 = vmatprep.subr.mxu0 %v1482_v2 }
 0x5ed   :  { %1357 = vmatpush3.msra.mxu0 %v1545_v8 }
 0x5ee   :  { %1358 = vmatprep.subr.mxu0 %v1482_v2 }
 0x5ef   :  { %1359 = vmatpush3.msra.mxu0 %v1554_v10 }
 0x5f0   :  { %1374 = vmatprep.subr.mxu0 %v1482_v2 }
 0x642   :  { %v1301_v15 = vpop.f32.mrf.mxu0 }
 0x644   :  { %v186_v16 = vpop.f32.mrf.mxu0 }
 0x646   :  { %v1661_v17 = vpop.f32.mrf.mxu0 }
 0x648   :  { %v1663_v18 = vpop.f32.mrf.mxu0 }
 0x64a   :  { %v1665_v19 = vpop.f32.mrf.mxu0 }
 0x64c   :  { %v1667_v20 = vpop.f32.mrf.mxu0 }
 0x6a8   :  { %v489_v21 = vpop.f32.mrf.mxu0 }
 0x6a9   :  { %v493_v22 = vadd.f32 %v489_v21, %v186_v16 }
 0x6aa   :  { %v1340_v23 = vpop.f32.mrf.mxu0 }
 0x6ab   :  { %1429 = vtanh.f32 %v493_v22  ;;  %v494_v25 = vsub.f32 0.0, %v493_v22 }
 0x6ad   :  { %v495_v26 = vmul.f32 1.442695, %v494_v25 }
 0x6af   :  { %1431 = vpow2.f32 %v495_v26 }
 0x6b8   :  { %v1430_v24 = vpop.eup %1429 }
 0x6b9   :  { %503 = vrot.lane.b32.xlu0 %v1430_v24, %s1484_s2 }
 0x6bc   :  { %v1432_v27 = vpop.eup %1431 }
 0x6bd   :  { %v497_v28 = vadd.f32 1.0, %v1432_v27 }
 0x6bf   :  { %1433 = vrcp.f32 %v497_v28 }
 0x6cc   :  { %v1434_v29 = vpop.eup %1433 }
 0x6cd   :  { %v501_v32 = vmul.f32 %v1434_v29, %v1616_v53 }
 0x72b   :  { %v504_v30 = vpop.permute.xlu0 %503 }
 0x72c   :  { %v506_v31 = vmul.f32 %v1434_v29, %v504_v30 }
 0x72e   :  { %508 = vrot.lane.b32.xlu1 %v506_v31, %s1485_s4 }
 0x7a0   :  { %v509_v33 = vpop.permute.xlu1 %508 }
 0x7a1   :  { %v511_v34 = vadd.f32 %v509_v33, %v501_v32 }
 0x7a3   :  { %1435 = vtanh.f32 %v511_v34 }
 0x7b0   :  { %v1436_v35 = vpop.eup %1435 }
 0x7b1   :  { %514 = vrot.lane.b32.xlu0 %v1436_v35, %s1484_s2 }
 0x823   :  { %v515_v36 = vpop.permute.xlu0 %514 }
 0x824   :  { %v517_v37 = vmul.f32 %v1434_v29, %v515_v36 }
 0x826   :  { %519 = vrot.lane.b32.xlu1 %v517_v37, %s1485_s4 }
 0x898   :  { %v520_v38 = vpop.permute.xlu1 %519 }
 0x899   :  { %1350 = vmatmul.mubr.msk.f32.vlgmr.msra.gmra.mxu1 %vm219_vm5, %v520_v38 }
 0x89a   :  { %1364 = vmatpush3.msra.mxu1 %v1523_v3  ;;  %1371 = vmatprep.mubr.msk.f32.mxu1 %vm1483_vm1, %v1482_v2 }
 0x89b   :  { %1365 = vmatprep.subr.mxu1 %v1482_v2 }
 0x89c   :  { %1366 = vmatpush3.msra.mxu1 %v1532_v5 }
 0x89d   :  { %1367 = vmatprep.subr.mxu1 %v1482_v2 }
 0x89e   :  { %1368 = vmatpush3.msra.mxu1 %v1545_v8 }
 0x89f   :  { %1369 = vmatprep.subr.mxu1 %v1482_v2 }
 0x8a0   :  { %1370 = vmatpush3.msra.mxu1 %v1554_v10 }
 0x8a1   :  { %1385 = vmatprep.subr.mxu1 %v1482_v2 }
 0x959   :  { %v589_v39 = vpop.f32.mrf.mxu1 }
 0x95a   :  { %v593_v40 = vadd.f32 %v1301_v15, %v589_v39 }
 0x95b   :  { %v1351_v41 = vpop.f32.mrf.mxu1 }
 0x95c   :  { %1437 = vtanh.f32 %v593_v40  ;;  %v594_v43 = vsub.f32 0.0, %v593_v40 }
 0x95e   :  { %v595_v44 = vmul.f32 1.442695, %v594_v43 }
 0x960   :  { %1439 = vpow2.f32 %v595_v44 }
 0x969   :  { %v1438_v42 = vpop.eup %1437 }
 0x96a   :  { %603 = vrot.lane.b32.xlu0 %v1438_v42, %s1484_s2 }
 0x96d   :  { %v1440_v45 = vpop.eup %1439 }
 0x96e   :  { %v597_v46 = vadd.f32 1.0, %v1440_v45 }
 0x970   :  { %1441 = vrcp.f32 %v597_v46 }
 0x97d   :  { %v1442_v47 = vpop.eup %1441 }
 0x97e   :  { %v601_v50 = vmul.f32 %v1442_v47, %v511_v34 }
 0x9dc   :  { %v604_v48 = vpop.permute.xlu0 %603 }
 0x9dd   :  { %v606_v49 = vmul.f32 %v1442_v47, %v604_v48 }
 0x9df   :  { %608 = vrot.lane.b32.xlu1 %v606_v49, %s1485_s4  ;;  %v1025_v49 = vld [vmem:[%s1757_s3] sm:$0x3f] }
 0xa51   :  { %v609_v51 = vpop.permute.xlu1 %608 }
 0xa52   :  { %v611_v52 = vadd.f32 %v609_v51, %v601_v50  ;;  %v1018_v50 = vld [vmem:[%s1756_s1] sm:$0xff] }
 0xa54   :  { %1443 = vtanh.f32 %v611_v52 }
 0xa61   :  { %v1444_v53 = vpop.eup %1443 }
 0xa62   :  { %614 = vrot.lane.b32.xlu0 %v1444_v53, %s1484_s2 }
 0xad4   :  { %v615_v54 = vpop.permute.xlu0 %614 }
 0xad5   :  { %v617_v55 = vmul.f32 %v1442_v47, %v615_v54 }
 0xad7   :  { %619 = vrot.lane.b32.xlu1 %v617_v55, %s1485_s4 }
 0xb49   :  { %v620_v56 = vpop.permute.xlu1 %619 }
 0xb4a   :  { %1361 = vmatmul.mubr.msk.f32.vlgmr.msra.gmra.mxu0 %vm219_vm5, %v620_v56 }
 0xb4b   :  { %1375 = vmatpush3.msra.mxu0 %v1523_v3  ;;  %1382 = vmatprep.mubr.msk.f32.mxu0 %vm1483_vm1, %v1482_v2 }
 0xb4c   :  { %1376 = vmatprep.subr.mxu0 %v1482_v2 }
 0xb4d   :  { %1377 = vmatpush3.msra.mxu0 %v1532_v5 }
 0xb4e   :  { %1378 = vmatprep.subr.mxu0 %v1482_v2 }
 0xb4f   :  { %1379 = vmatpush3.msra.mxu0 %v1545_v8 }
 0xb50   :  { %1380 = vmatprep.subr.mxu0 %v1482_v2 }
 0xb51   :  { %1381 = vmatpush3.msra.mxu0 %v1554_v10 }
 0xb52   :  { %1396 = vmatprep.subr.mxu0 %v1482_v2 }
 0xc0a   :  { %v689_v57 = vpop.f32.mrf.mxu0 }
 0xc0b   :  { %v693_v58 = vadd.f32 %v689_v57, %v1663_v18 }
 0xc0c   :  { %v1362_v59 = vpop.f32.mrf.mxu0 }
 0xc0d   :  { %1445 = vtanh.f32 %v693_v58  ;;  %v694_v61 = vsub.f32 0.0, %v693_v58 }
 0xc0f   :  { %v695_v62 = vmul.f32 1.442695, %v694_v61 }
 0xc11   :  { %1447 = vpow2.f32 %v695_v62 }
 0xc1a   :  { %v1446_v60 = vpop.eup %1445 }
 0xc1b   :  { %703 = vrot.lane.b32.xlu0 %v1446_v60, %s1484_s2 }
 0xc1e   :  { %v1448_v63 = vpop.eup %1447 }
 0xc1f   :  { %v697_v0 = vadd.f32 1.0, %v1448_v63 }
 0xc21   :  { %1449 = vrcp.f32 %v697_v0 }
 0xc2e   :  { %v1450_v1 = vpop.eup %1449 }
 0xc2f   :  { %v701_v7 = vmul.f32 %v1450_v1, %v611_v52 }
 0xc8d   :  { %v704_v4 = vpop.permute.xlu0 %703 }
 0xc8e   :  { %v706_v6 = vmul.f32 %v1450_v1, %v704_v4 }
 0xc90   :  { %708 = vrot.lane.b32.xlu1 %v706_v6, %s1485_s4 }
 0xd02   :  { %v709_v9 = vpop.permute.xlu1 %708 }
 0xd03   :  { %v711_v11 = vadd.f32 %v709_v9, %v701_v7 }
 0xd05   :  { %1451 = vtanh.f32 %v711_v11 }
 0xd12   :  { %v1452_v13 = vpop.eup %1451 }
 0xd13   :  { %714 = vrot.lane.b32.xlu0 %v1452_v13, %s1484_s2 }
 0xd85   :  { %v715_v14 = vpop.permute.xlu0 %714 }
 0xd86   :  { %v717_v15 = vmul.f32 %v1450_v1, %v715_v14 }
 0xd88   :  { %719 = vrot.lane.b32.xlu1 %v717_v15, %s1485_s4 }
 0xdfa   :  { %v720_v16 = vpop.permute.xlu1 %719 }
 0xdfb   :  { %1372 = vmatmul.mubr.msk.f32.vlgmr.msra.gmra.mxu1 %vm219_vm5, %v720_v16 }
 0xdfc   :  { %1386 = vmatpush3.msra.mxu1 %v1523_v3  ;;  %1393 = vmatprep.mubr.msk.f32.mxu1 %vm1483_vm1, %v1482_v2 }
 0xdfd   :  { %1387 = vmatprep.subr.mxu1 %v1482_v2 }
 0xdfe   :  { %1388 = vmatpush3.msra.mxu1 %v1532_v5 }
 0xdff   :  { %1389 = vmatprep.subr.mxu1 %v1482_v2 }
 0xe00   :  { %1390 = vmatpush3.msra.mxu1 %v1545_v8 }
 0xe01   :  { %1391 = vmatprep.subr.mxu1 %v1482_v2 }
 0xe02   :  { %1392 = vmatpush3.msra.mxu1 %v1554_v10 }
 0xe03   :  { %1401 = vmatprep.subr.mxu1 %v1482_v2 }
 0xebb   :  { %v789_v18 = vpop.f32.mrf.mxu1 }
 0xebc   :  { %v793_v3 = vadd.f32 %v1661_v17, %v789_v18 }
 0xebd   :  { %v1373_v21 = vpop.f32.mrf.mxu1 }
 0xebe   :  { %1453 = vtanh.f32 %v793_v3  ;;  %v794_v23 = vsub.f32 0.0, %v793_v3 }
 0xec0   :  { %v795_v5 = vmul.f32 1.442695, %v794_v23 }
 0xec2   :  { %1455 = vpow2.f32 %v795_v5 }
 0xecb   :  { %v1454_v22 = vpop.eup %1453 }
 0xecc   :  { %803 = vrot.lane.b32.xlu0 %v1454_v22, %s1484_s2 }
 0xecf   :  { %v1456_v24 = vpop.eup %1455 }
 0xed0   :  { %v797_v25 = vadd.f32 1.0, %v1456_v24 }
 0xed2   :  { %1457 = vrcp.f32 %v797_v25 }
 0xedf   :  { %v1458_v8 = vpop.eup %1457 }
 0xee0   :  { %v801_v10 = vmul.f32 %v1458_v8, %v711_v11 }
 0xf3e   :  { %v804_v26 = vpop.permute.xlu0 %803 }
 0xf3f   :  { %v806_v27 = vmul.f32 %v1458_v8, %v804_v26 }
 0xf41   :  { %808 = vrot.lane.b32.xlu1 %v806_v27, %s1485_s4 }
 0xfb3   :  { %v809_v28 = vpop.permute.xlu1 %808 }
 0xfb4   :  { %v811_v29 = vadd.f32 %v809_v28, %v801_v10 }
 0xfb6   :  { %1459 = vtanh.f32 %v811_v29 }
 0xfc3   :  { %v1460_v17 = vpop.eup %1459 }
 0xfc4   :  { %814 = vrot.lane.b32.xlu0 %v1460_v17, %s1484_s2 }
0x1036   :  { %v815_v30 = vpop.permute.xlu0 %814 }
0x1037   :  { %v817_v31 = vmul.f32 %v1458_v8, %v815_v30 }
0x1039   :  { %819 = vrot.lane.b32.xlu1 %v817_v31, %s1485_s4 }
0x10ab   :  { %v820_v32 = vpop.permute.xlu1 %819 }
0x10ac   :  { %1383 = vmatmul.mubr.msk.f32.vlgmr.msra.gmra.mxu0 %vm219_vm5, %v820_v32 }
0x10ad   :  { %1398 = vmatprep.mubr.msk.f32.mxu0 %vm1483_vm1, %v1482_v2  ;;  %1397 = vmatpush3.msk.msra.mxu0 %vm1030_vm12, %v1025_v49 }
0x116c   :  { %v889_v33 = vpop.f32.mrf.mxu0 }
0x116d   :  { %v893_v34 = vadd.f32 %v889_v33, %v1667_v20 }
0x116e   :  { %v1384_v35 = vpop.f32.mrf.mxu0 }
0x116f   :  { %1461 = vtanh.f32 %v893_v34  ;;  %v894_v37 = vsub.f32 0.0, %v893_v34 }
0x1171   :  { %v895_v38 = vmul.f32 1.442695, %v894_v37 }
0x1173   :  { %1463 = vpow2.f32 %v895_v38 }
0x117c   :  { %v1462_v36 = vpop.eup %1461 }
0x117d   :  { %903 = vrot.lane.b32.xlu0 %v1462_v36, %s1484_s2 }
0x1180   :  { %v1464_v39 = vpop.eup %1463 }
0x1181   :  { %v897_v40 = vadd.f32 1.0, %v1464_v39 }
0x1183   :  { %1465 = vrcp.f32 %v897_v40 }
0x1190   :  { %v1466_v41 = vpop.eup %1465 }
0x1191   :  { %v901_v44 = vmul.f32 %v1466_v41, %v811_v29 }
0x11ef   :  { %v904_v42 = vpop.permute.xlu0 %903 }
0x11f0   :  { %v906_v43 = vmul.f32 %v1466_v41, %v904_v42 }
0x11f2   :  { %908 = vrot.lane.b32.xlu1 %v906_v43, %s1485_s4 }
0x1264   :  { %v909_v45 = vpop.permute.xlu1 %908 }
0x1265   :  { %v911_v46 = vadd.f32 %v909_v45, %v901_v44 }
0x1267   :  { %1467 = vtanh.f32 %v911_v46 }
0x1274   :  { %v1468_v20 = vpop.eup %1467 }
0x1275   :  { %914 = vrot.lane.b32.xlu0 %v1468_v20, %s1484_s2 }
0x12e7   :  { %v915_v47 = vpop.permute.xlu0 %914 }
0x12e8   :  { %v917_v48 = vmul.f32 %v1466_v41, %v915_v47 }
0x12ea   :  { %919 = vrot.lane.b32.xlu1 %v917_v48, %s1485_s4 }
0x12ee   :  { %1020 = vperm.xlu1 %1412, %v1018_v50  }
0x135c   :  { %v920_v51 = vpop.permute.xlu1 %919 }
0x135d   :  { %1394 = vmatmul.mubr.msk.f32.vlgmr.msra.gmra.mxu1 %vm219_vm5, %v920_v51 }
0x135e   :  { %1403 = vmatprep.mubr.msk.f32.mxu1 %vm1483_vm1, %v1482_v2 }
0x1369   :  { %v1021_v52 = vpop.permute.xlu1 %1020 }
0x136a   :  { %vm1022_vm14 = vcmp.eq.s32.totalorder %v1021_v52, %v1574_v12 }
0x136b   :  { %v1230_v53 = vsel %vm1022_vm14, 1.0, %v1482_v2 }
0x136c   :  { %1399 = vmatmul.mubr.msk.f32.vlgmr.msra.gmra.mxu0 %vm1026_vm13, %v1230_v53 }
0x141d   :  { %v989_v54 = vpop.f32.mrf.mxu1 }
0x141e   :  { %v993_v55 = vadd.f32 %v1665_v19, %v989_v54 }
0x141f   :  { %v1395_v56 = vpop.f32.mrf.mxu1 }
0x1420   :  { %1469 = vtanh.f32 %v993_v55  ;;  %v994_v60 = vsub.f32 0.0, %v993_v55 }
0x1422   :  { %v995_v61 = vmul.f32 1.442695, %v994_v60 }
0x1424   :  { %1471 = vpow2.f32 %v995_v61 }
0x142c   :  { %v1100_v57 = vpop.f32.mrf.mxu0 }
0x142d   :  { %v1470_v58 = vpop.eup %1469  ;;  %v1104_v13 = vmul.f32 %v1100_v57, %v1100_v57 }
0x142e   :  { %v1400_v59 = vpop.f32.mrf.mxu0  ;;  %1003 = vrot.lane.b32.xlu0 %v1470_v58, %s1484_s2 }
0x142f   :  { %v1105_v14 = vsel %vm219_vm5, %v1104_v13, 0.0 }
0x1431   :  { %v1472_v62 = vpop.eup %1471 }
0x1432   :  { %v997_v63 = vadd.f32 1.0, %v1472_v62 }
0x1434   :  { %1473 = vrcp.f32 %v997_v63 }
0x1441   :  { %v1474_v12 = vpop.eup %1473 }
0x1442   :  { %v1001_v1 = vmul.f32 %v1474_v12, %v911_v46 }
0x14a0   :  { %v1004_v0 = vpop.permute.xlu0 %1003 }
0x14a1   :  { %v1006_v2 = vmul.f32 %v1474_v12, %v1004_v0 }
0x14a3   :  { %1008 = vrot.lane.b32.xlu0 %v1006_v2, %s1485_s4 }
0x1515   :  { %v1009_v19 = vpop.permute.xlu0 %1008 }
0x1516   :  { %v1011_v4 = vadd.f32 %v1009_v19, %v1001_v1 }
0x1518   :  { %1475 = vtanh.f32 %v1011_v4 }
0x1525   :  { %v1476_v6 = vpop.eup %1475 }
0x1526   :  { %1014 = vrot.lane.b32.xlu1 %v1476_v6, %s1484_s2 }
0x1598   :  { %v1015_v7 = vpop.permute.xlu1 %1014 }
0x1599   :  { %v1017_v9 = vmul.f32 %v1474_v12, %v1015_v7 }
0x159b   :  { %v1111_v11 = vmul.f32 %v1017_v9, %v1017_v9 }
0x159d   :  { %1113 = vrot.lane.b32.xlu0 %v1111_v11, %s1485_s4 }
0x15bc   :  { %1106 = vadd.xlane.f32.xlu0 %v1105_v14 }
0x160f   :  { %v1114_v15 = vpop.permute.xlu0 %1113 }
0x1610   :  { %v1116_v16 = vsel %vm219_vm5, %v1114_v15, 0.0 }
0x1611   :  { %1117 = vadd.xlane.f32.xlu1 %v1116_v16 }
0x1645   :  { %v1107_v23 = vpop.xlane.xlu0 %1106 }
0x1646   :  { %v1108_v5 = vmax.f32 %v1107_v23, 1e-30 }
0x169a   :  { %v1118_v18 = vpop.xlane.xlu1 %1117 }
0x169b   :  { %v1119_v3 = vmax.f32 %v1118_v18, 1e-30 }
0x169d   :  { %1477 = vrsqrt.f32 %v1119_v3 }
0x169e   :  { %1479 = vrsqrt.f32 %v1108_v5 }
0x16aa   :  { %v1478_v21 = vpop.eup %1477 }
0x16ab   :  { %v1121_v22 = vmul.f32 %v1478_v21, %v1017_v9  ;;  %v1480_v24 = vpop.eup %1479 }
0x16ac   :  { %v1110_v8 = vmul.f32 %v1480_v24, %v1100_v57 }
0x16ad   :  { %1123 = vrot.lane.b32.xlu0 %v1121_v22, %s1485_s4 }
0x171f   :  { %v1124_v25 = vpop.permute.xlu0 %1123 }
0x1720   :  { %1402 = vmatpush3.xpose.msk.msra.mxu1 %vm219_vm5, %v1124_v25 }
0x1723   :  { %1404 = vmatmul.mubr.msk.f32.vlgmr.msra.gmra.mxu1 %vm219_vm5, %v1110_v8 }
0x17e3   :  { %v1196_v26 = vpop.f32.mrf.mxu1 }
0x17e4   :  { %1201 = vst.msk [vmem:[%s1758_s5] sm:$0xff] %vm1200_vm15, %v1196_v26 }
0x17e5   :  { %v1405_v27 = vpop.f32.mrf.mxu1 }

</bundles_post_ra>
